<compile_context>
chip_gen: v7x
topology: tpu7x:2x2x1
jax: 0.10.0
libtpu: 0.0.40
codegen_flags: <defaults>
</compile_context>

<pallas_src>
import functools

import jax
import jax.numpy as jnp
from jax import lax
from jax.experimental import pallas as pl
from jax.experimental.pallas import tpu as pltpu

NEG_SLOPE = 0.01                 # F.leaky_relu default negative_slope
MXU_DTYPE = jnp.float32          # flip to jnp.bfloat16 on v6e/v7x if desired


def _round_up(x, m):
    return ((x + m - 1) // m) * m


# ----------------------------------------------------------------------------
# Pallas kernels
# ----------------------------------------------------------------------------
def _conv_pool_lrelu_kernel(x_ref, w_ref, b_ref, o_ref, *, slope):
    """Fused conv(3x3) -> max-pool(2x2) -> bias -> leaky_relu for one M-tile.

    x_ref: (4, K, TILE_M)  im2col patches, axis 0 = 2x2 pooling candidate
    w_ref: (Cout, K)       conv weights flattened over (Cin, kh, kw)
    b_ref: (Cout, 1)       bias (broadcast over lanes)
    o_ref: (Cout, TILE_M)  pooled + activated output (lane-dense store)
    """
    w = w_ref[...]
    y = jnp.dot(w, x_ref[0], preferred_element_type=jnp.float32)
    for c in range(1, 4):
        y = jnp.maximum(
            y, jnp.dot(w, x_ref[c], preferred_element_type=jnp.float32))
    y = y + b_ref[...]
    o_ref[...] = jnp.where(y >= 0, y, slope * y).astype(o_ref.dtype)


def _linear_kernel(x_ref, w_ref, b_ref, o_ref):
    """o = x @ w + b for one row-tile (output columns padded to 128)."""
    y = jnp.dot(x_ref[...], w_ref[...], preferred_element_type=jnp.float32)
    o_ref[...] = (y + b_ref[...]).astype(o_ref.dtype)


# ----------------------------------------------------------------------------
# Wrappers (tiling / padding / BlockSpecs)
# ----------------------------------------------------------------------------
def _conv_pool_patches(x_cnhw):
    """(Cin, N, H, W) -> (4, Cin*9, N*Ho*Wo) patches for fused conv+pool."""
    Cin, N, H, W = x_cnhw.shape
    Ho, Wo = H // 2, W // 2
    xp = jnp.pad(x_cnhw, ((0, 0), (0, 0), (1, 1), (1, 1)))
    taps = [xp[:, :, i:i + H, j:j + W] for i in range(3) for j in range(3)]
    p = jnp.stack(taps, axis=1)                        # (Cin, 9, N, H, W)
    p = p.reshape(Cin, 9, N, Ho, 2, Wo, 2)             # split for pooling
    p = p.transpose(4, 6, 0, 1, 2, 3, 5)               # (dh, dw, Cin, 9, N, Ho, Wo)
    return p.reshape(4, Cin * 9, N * Ho * Wo)


def conv_pool_lrelu(x_cnhw, w_mat, b_col, *, slope=NEG_SLOPE, tile_m_max=512,
                    mxu_dtype=MXU_DTYPE):
    """Fused 3x3/pad-1 conv + leaky_relu + 2x2/stride-2 max-pool.

    x_cnhw: (Cin, N, H, W)  channel-major activations
    w_mat : (Cout, Cin*9)   OIHW weight flattened over (Cin, kh, kw)
    b_col : (Cout, 1)
    returns (Cout, N, H//2, W//2)
    """
    Cin, N, H, W = x_cnhw.shape
    Cout, K = w_mat.shape
    assert K == Cin * 9
    Ho, Wo = H // 2, W // 2
    M = N * Ho * Wo

    patches = _conv_pool_patches(x_cnhw)               # (4, K, M)
    m128 = _round_up(M, 128)
    tile_m = m128 if m128 <= tile_m_max else tile_m_max
    m_pad = _round_up(M, tile_m)
    if m_pad != M:
        patches = jnp.pad(patches, ((0, 0), (0, 0), (0, m_pad - M)))

    out = pl.pallas_call(
        functools.partial(_conv_pool_lrelu_kernel, slope=slope),
        out_shape=jax.ShapeDtypeStruct((Cout, m_pad), jnp.float32),
        grid=(m_pad // tile_m,),
        in_specs=[
            pl.BlockSpec((4, K, tile_m), lambda m: (0, 0, m)),
            pl.BlockSpec((Cout, K), lambda m: (0, 0)),
            pl.BlockSpec((Cout, 1), lambda m: (0, 0)),
        ],
        out_specs=pl.BlockSpec((Cout, tile_m), lambda m: (0, m)),
        compiler_params=pltpu.CompilerParams(
            dimension_semantics=("parallel",)),
    )(patches.astype(mxu_dtype), w_mat.astype(mxu_dtype),
      b_col.astype(jnp.float32))

    return out[:, :M].reshape(Cout, N, Ho, Wo)


def linear(x, w_pad, b_pad, *, tile_r_max=256, mxu_dtype=MXU_DTYPE):
    """x: (R, K), w_pad: (K, Ncol>=128 multiple), b_pad: (1, Ncol) -> (R, Ncol)."""
    R, K = x.shape
    K2, Ncol = w_pad.shape
    assert K == K2
    r8 = _round_up(R, 8)
    tile_r = r8 if r8 <= tile_r_max else tile_r_max
    r_pad = _round_up(R, tile_r)
    if r_pad != R:
        x = jnp.pad(x, ((0, r_pad - R), (0, 0)))

    out = pl.pallas_call(
        _linear_kernel,
        out_shape=jax.ShapeDtypeStruct((r_pad, Ncol), jnp.float32),
        grid=(r_pad // tile_r,),
        in_specs=[
            pl.BlockSpec((tile_r, K), lambda r: (r, 0)),
            pl.BlockSpec((K, Ncol), lambda r: (0, 0)),
            pl.BlockSpec((1, Ncol), lambda r: (0, 0)),
        ],
        out_specs=pl.BlockSpec((tile_r, Ncol), lambda r: (r, 0)),
        compiler_params=pltpu.CompilerParams(
            dimension_semantics=("parallel",)),
    )(x.astype(mxu_dtype), w_pad.astype(mxu_dtype), b_pad.astype(jnp.float32))

    return out[:R]


# ----------------------------------------------------------------------------
# Parameters & forward pass
# ----------------------------------------------------------------------------
def init_params(key, in_channels=1, num_classes=10):
    """Deterministic synthetic parameters matching the PyTorch module shapes."""
    ks = jax.random.split(key, 6)

    def uniform(k, shape, fan_in):
        bound = 1.0 / jnp.sqrt(jnp.float32(fan_in))
        return jax.random.uniform(k, shape, jnp.float32, -bound, bound)

    return {
        "w1": uniform(ks[0], (8, in_channels, 3, 3), in_channels * 9),   # OIHW
        "b1": uniform(ks[1], (8,), in_channels * 9),
        "w2": uniform(ks[2], (16, 8, 3, 3), 8 * 9),
        "b2": uniform(ks[3], (16,), 8 * 9),
        "wf": uniform(ks[4], (num_classes, 16 * 7 * 7), 16 * 7 * 7),
        "bf": uniform(ks[5], (num_classes,), 16 * 7 * 7),
    }


def prepare_params(params):
    """One-time weight relayouts (outside the per-forward hot path)."""
    w1, w2, wf = params["w1"], params["w2"], params["wf"]
    c1o, c1i = w1.shape[0], w1.shape[1]
    c2o, c2i = w2.shape[0], w2.shape[1]
    nc, kf = wf.shape
    ncp = _round_up(nc, 128)                       # lane-dense FC output
    wf_pad = jnp.zeros((kf, ncp), jnp.float32).at[:, :nc].set(
        wf.T.astype(jnp.float32))
    bf_pad = jnp.zeros((1, ncp), jnp.float32).at[:, :nc].set(
        params["bf"].astype(jnp.float32)[None, :])
    return {
        # OIHW flattened over (I, H, W) == patch K-order (cin, kh, kw)
        "w1m": w1.reshape(c1o, c1i * 9).astype(jnp.float32),
        "b1c": params["b1"].reshape(c1o, 1).astype(jnp.float32),
        "w2m": w2.reshape(c2o, c2i * 9).astype(jnp.float32),
        "b2c": params["b2"].reshape(c2o, 1).astype(jnp.float32),
        "wf_pad": wf_pad,
        "bf_pad": bf_pad,
    }


def cnn_forward(x_nchw, prep, *, num_classes=10):
    N = x_nchw.shape[0]
    # channel-major activation layout (Cin, N, H, W); Cin=1 so this is trivial
    x = jnp.transpose(x_nchw, (1, 0, 2, 3)).astype(jnp.float32)

    y1 = conv_pool_lrelu(x, prep["w1m"], prep["b1c"])    # (8, N, 14, 14)
    y2 = conv_pool_lrelu(y1, prep["w2m"], prep["b2c"])   # (16, N, 7, 7)

    # PyTorch flatten order per sample is (c, h, w) == c*49 + h*7 + w
    flat = y2.reshape(16, N, 49).transpose(1, 0, 2).reshape(N, 16 * 49)
    logits_pad = linear(flat, prep["wf_pad"], prep["bf_pad"])
    return logits_pad[:, :num_classes]


# ----------------------------------------------------------------------------
# Pure-JAX reference (correctness check)
# ----------------------------------------------------------------------------
def reference_forward(x_nchw, params):
    def conv(x, w, b):
        y = lax.conv_general_dilated(
            x, w, (1, 1), ((1, 1), (1, 1)),
            dimension_numbers=("NCHW", "OIHW", "NCHW"),
            precision=lax.Precision.HIGHEST)
        return y + b[None, :, None, None]

    def lrelu(y):
        return jnp.where(y >= 0, y, NEG_SLOPE * y)

    def pool(y):
        return lax.reduce_window(y, -jnp.inf, lax.max,
                                 (1, 1, 2, 2), (1, 1, 2, 2), "VALID")

    y = pool(lrelu(conv(x_nchw, params["w1"], params["b1"])))
    y = pool(lrelu(conv(y, params["w2"], params["b2"])))
    flat = y.reshape(y.shape[0], -1)
    return (jnp.dot(flat, params["wf"].T, precision=lax.Precision.HIGHEST)
            + params["bf"])


# ----------------------------------------------------------------------------
if __name__ == "__main__":
    key = jax.random.PRNGKey(0)
    kx, kp = jax.random.split(key)

    # MNIST-like shape implied by fc1 = Linear(16*7*7, 10): (N, 1, 28, 28)
    x = jax.random.normal(kx, (2, 1, 28, 28), dtype=jnp.float32)
    params = init_params(kp)
    prep = prepare_params(params)

    fwd = jax.jit(cnn_forward, static_argnames=("num_classes",))
    out = jax.block_until_ready(fwd(x, prep, num_classes=10))
    ref = jax.block_until_ready(reference_forward(x, params))

    assert out.shape == (2, 10), out.shape
    err = jnp.max(jnp.abs(out - ref))
    assert jnp.allclose(out, ref, rtol=1e-3, atol=1e-3), f"max abs err {err}"

    print("KERNEL_OK")
</pallas_src>

<mosaic_0001>
module attributes {stable_mosaic.version = 11 : i64} {
  func.func @_conv_pool_lrelu_kernel(%arg0: i32, %arg1: memref<4x9x512xf32, #tpu.memory_space<vmem>>, %arg2: memref<8x9xf32, #tpu.memory_space<vmem>>, %arg3: memref<8x1xf32, #tpu.memory_space<vmem>>, %arg4: memref<8x512xf32, #tpu.memory_space<vmem>>) attributes {dimension_semantics = [#tpu.dimension_semantics<parallel>], iteration_bounds = array<i64: 1>, scalar_prefetch = 0 : i64, scratch_operands = 0 : i64, tpu.core_type = #tpu.core_type<tc>, window_params = [{transform_indices = @transform_0, window_bounds = array<i64: 4, 9, 512>}, {pipeline_mode = #tpu.pipeline_mode<synchronous>, transform_indices = @transform_1, window_bounds = array<i64: 8, 9>}, {pipeline_mode = #tpu.pipeline_mode<synchronous>, transform_indices = @transform_2, window_bounds = array<i64: 8, 1>}, {transform_indices = @transform_3, window_bounds = array<i64: 8, 512>}]} {
    %c0 = arith.constant 0 : index
    %c0_0 = arith.constant 0 : index
    %0 = vector.load %arg2[%c0, %c0_0] : memref<8x9xf32, #tpu.memory_space<vmem>>, vector<8x9xf32>
    %c0_1 = arith.constant 0 : index
    %c0_2 = arith.constant 0 : index
    %c0_3 = arith.constant 0 : index
    %1 = vector.load %arg1[%c0_1, %c0_2, %c0_3] : memref<4x9x512xf32, #tpu.memory_space<vmem>>, vector<1x9x512xf32>
    %2 = vector.shape_cast %1 : vector<1x9x512xf32> to vector<9x512xf32>
    %cst = arith.constant dense<0.000000e+00> : vector<8x512xf32>
    %3 = tpu.matmul %0, %2, %cst {dimension_numbers = #tpu.dot_dimension_numbers<[1], [0], [0], [1], [0, 0, 1, 1], [], []>} : vector<8x9xf32>, vector<9x512xf32>, vector<8x512xf32> -> vector<8x512xf32>
    %c1 = arith.constant 1 : index
    %c0_4 = arith.constant 0 : index
    %c0_5 = arith.constant 0 : index
    %4 = vector.load %arg1[%c1, %c0_4, %c0_5] : memref<4x9x512xf32, #tpu.memory_space<vmem>>, vector<1x9x512xf32>
    %5 = vector.shape_cast %4 : vector<1x9x512xf32> to vector<9x512xf32>
    %cst_6 = arith.constant dense<0.000000e+00> : vector<8x512xf32>
    %6 = tpu.matmul %0, %5, %cst_6 {dimension_numbers = #tpu.dot_dimension_numbers<[1], [0], [0], [1], [0, 0, 1, 1], [], []>} : vector<8x9xf32>, vector<9x512xf32>, vector<8x512xf32> -> vector<8x512xf32>
    %7 = arith.maximumf %3, %6 : vector<8x512xf32>
    %c2 = arith.constant 2 : index
    %c0_7 = arith.constant 0 : index
    %c0_8 = arith.constant 0 : index
    %8 = vector.load %arg1[%c2, %c0_7, %c0_8] : memref<4x9x512xf32, #tpu.memory_space<vmem>>, vector<1x9x512xf32>
    %9 = vector.shape_cast %8 : vector<1x9x512xf32> to vector<9x512xf32>
    %cst_9 = arith.constant dense<0.000000e+00> : vector<8x512xf32>
    %10 = tpu.matmul %0, %9, %cst_9 {dimension_numbers = #tpu.dot_dimension_numbers<[1], [0], [0], [1], [0, 0, 1, 1], [], []>} : vector<8x9xf32>, vector<9x512xf32>, vector<8x512xf32> -> vector<8x512xf32>
    %11 = arith.maximumf %7, %10 : vector<8x512xf32>
    %c3 = arith.constant 3 : index
    %c0_10 = arith.constant 0 : index
    %c0_11 = arith.constant 0 : index
    %12 = vector.load %arg1[%c3, %c0_10, %c0_11] : memref<4x9x512xf32, #tpu.memory_space<vmem>>, vector<1x9x512xf32>
    %13 = vector.shape_cast %12 : vector<1x9x512xf32> to vector<9x512xf32>
    %cst_12 = arith.constant dense<0.000000e+00> : vector<8x512xf32>
    %14 = tpu.matmul %0, %13, %cst_12 {dimension_numbers = #tpu.dot_dimension_numbers<[1], [0], [0], [1], [0, 0, 1, 1], [], []>} : vector<8x9xf32>, vector<9x512xf32>, vector<8x512xf32> -> vector<8x512xf32>
    %15 = arith.maximumf %11, %14 : vector<8x512xf32>
    %c0_13 = arith.constant 0 : index
    %c0_14 = arith.constant 0 : index
    %16 = vector.load %arg3[%c0_13, %c0_14] : memref<8x1xf32, #tpu.memory_space<vmem>>, vector<8x1xf32>
    %17 = vector.broadcast %16 : vector<8x1xf32> to vector<8x512xf32>
    %18 = arith.addf %15, %17 : vector<8x512xf32>
    %cst_15 = arith.constant 0.000000e+00 : f32
    %19 = vector.broadcast %cst_15 : f32 to vector<8x512xf32>
    %20 = arith.cmpf oge, %18, %19 : vector<8x512xf32>
    %cst_16 = arith.constant 0.00999999977 : f32
    %21 = vector.broadcast %cst_16 : f32 to vector<8x512xf32>
    %22 = arith.mulf %21, %18 : vector<8x512xf32>
    %23 = arith.select %20, %18, %22 : vector<8x512xi1>, vector<8x512xf32>
    %c0_17 = arith.constant 0 : index
    %c0_18 = arith.constant 0 : index
    %24 = vector.load %arg4[%c0_17, %c0_18] : memref<8x512xf32, #tpu.memory_space<vmem>>, vector<8x512xf32>
    tpu.vector_store %arg4[%c0_17, %c0_18], %23 {strides = array<i32>} : memref<8x512xf32, #tpu.memory_space<vmem>>, vector<8x512xf32>,
    return
  }
  func.func @transform_0(%arg0: i32) -> (i32, i32, i32) {
    %c0_i32 = arith.constant 0 : i32
    %c0_i32_0 = arith.constant 0 : i32
    %c0_i32_1 = arith.constant 0 : i32
    return %c0_i32, %c0_i32_0, %arg0 : i32, i32, i32
  }
  func.func @transform_1(%arg0: i32) -> (i32, i32) {
    %c0_i32 = arith.constant 0 : i32
    %c0_i32_0 = arith.constant 0 : i32
    %c0_i32_1 = arith.constant 0 : i32
    return %c0_i32, %c0_i32_0 : i32, i32
  }
  func.func @transform_2(%arg0: i32) -> (i32, i32) {
    %c0_i32 = arith.constant 0 : i32
    %c0_i32_0 = arith.constant 0 : i32
    %c0_i32_1 = arith.constant 0 : i32
    return %c0_i32, %c0_i32_0 : i32, i32
  }
  func.func @transform_3(%arg0: i32) -> (i32, i32) {
    %c0_i32 = arith.constant 0 : i32
    %c0_i32_0 = arith.constant 0 : i32
    return %c0_i32, %arg0 : i32, i32
  }
}

module attributes {stable_mosaic.version = 11 : i64} {
  func.func @_conv_pool_lrelu_kernel(%arg0: i32, %arg1: memref<4x72x128xf32, #tpu.memory_space<vmem>>, %arg2: memref<16x72xf32, #tpu.memory_space<vmem>>, %arg3: memref<16x1xf32, #tpu.memory_space<vmem>>, %arg4: memref<16x128xf32, #tpu.memory_space<vmem>>) attributes {dimension_semantics = [#tpu.dimension_semantics<parallel>], iteration_bounds = array<i64: 1>, scalar_prefetch = 0 : i64, scratch_operands = 0 : i64, tpu.core_type = #tpu.core_type<tc>, window_params = [{transform_indices = @transform_0, window_bounds = array<i64: 4, 72, 128>}, {pipeline_mode = #tpu.pipeline_mode<synchronous>, transform_indices = @transform_1, window_bounds = array<i64: 16, 72>}, {pipeline_mode = #tpu.pipeline_mode<synchronous>, transform_indices = @transform_2, window_bounds = array<i64: 16, 1>}, {transform_indices = @transform_3, window_bounds = array<i64: 16, 128>}]} {
    %c0 = arith.constant 0 : index
    %c0_0 = arith.constant 0 : index
    %0 = vector.load %arg2[%c0, %c0_0] : memref<16x72xf32, #tpu.memory_space<vmem>>, vector<16x72xf32>
    %c0_1 = arith.constant 0 : index
    %c0_2 = arith.constant 0 : index
    %c0_3 = arith.constant 0 : index
    %1 = vector.load %arg1[%c0_1, %c0_2, %c0_3] : memref<4x72x128xf32, #tpu.memory_space<vmem>>, vector<1x72x128xf32>
    %2 = vector.shape_cast %1 : vector<1x72x128xf32> to vector<72x128xf32>
    %cst = arith.constant dense<0.000000e+00> : vector<16x128xf32>
    %3 = tpu.matmul %0, %2, %cst {dimension_numbers = #tpu.dot_dimension_numbers<[1], [0], [0], [1], [0, 0, 1, 1], [], []>} : vector<16x72xf32>, vector<72x128xf32>, vector<16x128xf32> -> vector<16x128xf32>
    %c1 = arith.constant 1 : index
    %c0_4 = arith.constant 0 : index
    %c0_5 = arith.constant 0 : index
    %4 = vector.load %arg1[%c1, %c0_4, %c0_5] : memref<4x72x128xf32, #tpu.memory_space<vmem>>, vector<1x72x128xf32>
    %5 = vector.shape_cast %4 : vector<1x72x128xf32> to vector<72x128xf32>
    %cst_6 = arith.constant dense<0.000000e+00> : vector<16x128xf32>
    %6 = tpu.matmul %0, %5, %cst_6 {dimension_numbers = #tpu.dot_dimension_numbers<[1], [0], [0], [1], [0, 0, 1, 1], [], []>} : vector<16x72xf32>, vector<72x128xf32>, vector<16x128xf32> -> vector<16x128xf32>
    %7 = arith.maximumf %3, %6 : vector<16x128xf32>
    %c2 = arith.constant 2 : index
    %c0_7 = arith.constant 0 : index
    %c0_8 = arith.constant 0 : index
    %8 = vector.load %arg1[%c2, %c0_7, %c0_8] : memref<4x72x128xf32, #tpu.memory_space<vmem>>, vector<1x72x128xf32>
    %9 = vector.shape_cast %8 : vector<1x72x128xf32> to vector<72x128xf32>
    %cst_9 = arith.constant dense<0.000000e+00> : vector<16x128xf32>
    %10 = tpu.matmul %0, %9, %cst_9 {dimension_numbers = #tpu.dot_dimension_numbers<[1], [0], [0], [1], [0, 0, 1, 1], [], []>} : vector<16x72xf32>, vector<72x128xf32>, vector<16x128xf32> -> vector<16x128xf32>
    %11 = arith.maximumf %7, %10 : vector<16x128xf32>
    %c3 = arith.constant 3 : index
    %c0_10 = arith.constant 0 : index
    %c0_11 = arith.constant 0 : index
    %12 = vector.load %arg1[%c3, %c0_10, %c0_11] : memref<4x72x128xf32, #tpu.memory_space<vmem>>, vector<1x72x128xf32>
    %13 = vector.shape_cast %12 : vector<1x72x128xf32> to vector<72x128xf32>
    %cst_12 = arith.constant dense<0.000000e+00> : vector<16x128xf32>
    %14 = tpu.matmul %0, %13, %cst_12 {dimension_numbers = #tpu.dot_dimension_numbers<[1], [0], [0], [1], [0, 0, 1, 1], [], []>} : vector<16x72xf32>, vector<72x128xf32>, vector<16x128xf32> -> vector<16x128xf32>
    %15 = arith.maximumf %11, %14 : vector<16x128xf32>
    %c0_13 = arith.constant 0 : index
    %c0_14 = arith.constant 0 : index
    %16 = vector.load %arg3[%c0_13, %c0_14] : memref<16x1xf32, #tpu.memory_space<vmem>>, vector<16x1xf32>
    %17 = vector.broadcast %16 : vector<16x1xf32> to vector<16x128xf32>
    %18 = arith.addf %15, %17 : vector<16x128xf32>
    %cst_15 = arith.constant 0.000000e+00 : f32
    %19 = vector.broadcast %cst_15 : f32 to vector<16x128xf32>
    %20 = arith.cmpf oge, %18, %19 : vector<16x128xf32>
    %cst_16 = arith.constant 0.00999999977 : f32
    %21 = vector.broadcast %cst_16 : f32 to vector<16x128xf32>
    %22 = arith.mulf %21, %18 : vector<16x128xf32>
    %23 = arith.select %20, %18, %22 : vector<16x128xi1>, vector<16x128xf32>
    %c0_17 = arith.constant 0 : index
    %c0_18 = arith.constant 0 : index
    %24 = vector.load %arg4[%c0_17, %c0_18] : memref<16x128xf32, #tpu.memory_space<vmem>>, vector<16x128xf32>
    tpu.vector_store %arg4[%c0_17, %c0_18], %23 {strides = array<i32>} : memref<16x128xf32, #tpu.memory_space<vmem>>, vector<16x128xf32>,
    return
  }
  func.func @transform_0(%arg0: i32) -> (i32, i32, i32) {
    %c0_i32 = arith.constant 0 : i32
    %c0_i32_0 = arith.constant 0 : i32
    %c0_i32_1 = arith.constant 0 : i32
    return %c0_i32, %c0_i32_0, %arg0 : i32, i32, i32
  }
  func.func @transform_1(%arg0: i32) -> (i32, i32) {
    %c0_i32 = arith.constant 0 : i32
    %c0_i32_0 = arith.constant 0 : i32
    %c0_i32_1 = arith.constant 0 : i32
    return %c0_i32, %c0_i32_0 : i32, i32
  }
  func.func @transform_2(%arg0: i32) -> (i32, i32) {
    %c0_i32 = arith.constant 0 : i32
    %c0_i32_0 = arith.constant 0 : i32
    %c0_i32_1 = arith.constant 0 : i32
    return %c0_i32, %c0_i32_0 : i32, i32
  }
  func.func @transform_3(%arg0: i32) -> (i32, i32) {
    %c0_i32 = arith.constant 0 : i32
    %c0_i32_0 = arith.constant 0 : i32
    return %c0_i32, %arg0 : i32, i32
  }
}

module attributes {stable_mosaic.version = 11 : i64} {
  func.func @_linear_kernel(%arg0: i32, %arg1: memref<8x784xf32, #tpu.memory_space<vmem>>, %arg2: memref<784x128xf32, #tpu.memory_space<vmem>>, %arg3: memref<1x128xf32, #tpu.memory_space<vmem>>, %arg4: memref<8x128xf32, #tpu.memory_space<vmem>>) attributes {dimension_semantics = [#tpu.dimension_semantics<parallel>], iteration_bounds = array<i64: 1>, scalar_prefetch = 0 : i64, scratch_operands = 0 : i64, tpu.core_type = #tpu.core_type<tc>, window_params = [{transform_indices = @transform_0, window_bounds = array<i64: 8, 784>}, {pipeline_mode = #tpu.pipeline_mode<synchronous>, transform_indices = @transform_1, window_bounds = array<i64: 784, 128>}, {pipeline_mode = #tpu.pipeline_mode<synchronous>, transform_indices = @transform_2, window_bounds = array<i64: 1, 128>}, {transform_indices = @transform_3, window_bounds = array<i64: 8, 128>}]} {
    %c0 = arith.constant 0 : index
    %c0_0 = arith.constant 0 : index
    %0 = vector.load %arg1[%c0, %c0_0] : memref<8x784xf32, #tpu.memory_space<vmem>>, vector<8x784xf32>
    %c0_1 = arith.constant 0 : index
    %c0_2 = arith.constant 0 : index
    %1 = vector.load %arg2[%c0_1, %c0_2] : memref<784x128xf32, #tpu.memory_space<vmem>>, vector<784x128xf32>
    %cst = arith.constant dense<0.000000e+00> : vector<8x128xf32>
    %2 = tpu.matmul %0, %1, %cst {dimension_numbers = #tpu.dot_dimension_numbers<[1], [0], [0], [1], [0, 0, 1, 1], [], []>} : vector<8x784xf32>, vector<784x128xf32>, vector<8x128xf32> -> vector<8x128xf32>
    %c0_3 = arith.constant 0 : index
    %c0_4 = arith.constant 0 : index
    %3 = vector.load %arg3[%c0_3, %c0_4] : memref<1x128xf32, #tpu.memory_space<vmem>>, vector<1x128xf32>
    %4 = vector.broadcast %3 : vector<1x128xf32> to vector<8x128xf32>
    %5 = arith.addf %2, %4 : vector<8x128xf32>
    %c0_5 = arith.constant 0 : index
    %c0_6 = arith.constant 0 : index
    %6 = vector.load %arg4[%c0_5, %c0_6] : memref<8x128xf32, #tpu.memory_space<vmem>>, vector<8x128xf32>
    tpu.vector_store %arg4[%c0_5, %c0_6], %5 {strides = array<i32>} : memref<8x128xf32, #tpu.memory_space<vmem>>, vector<8x128xf32>,
    return
  }
  func.func @transform_0(%arg0: i32) -> (i32, i32) {
    %c0_i32 = arith.constant 0 : i32
    %c0_i32_0 = arith.constant 0 : i32
    return %arg0, %c0_i32 : i32, i32
  }
  func.func @transform_1(%arg0: i32) -> (i32, i32) {
    %c0_i32 = arith.constant 0 : i32
    %c0_i32_0 = arith.constant 0 : i32
    %c0_i32_1 = arith.constant 0 : i32
    return %c0_i32, %c0_i32_0 : i32, i32
  }
  func.func @transform_2(%arg0: i32) -> (i32, i32) {
    %c0_i32 = arith.constant 0 : i32
    %c0_i32_0 = arith.constant 0 : i32
    %c0_i32_1 = arith.constant 0 : i32
    return %c0_i32, %c0_i32_0 : i32, i32
  }
  func.func @transform_3(%arg0: i32) -> (i32, i32) {
    %c0_i32 = arith.constant 0 : i32
    %c0_i32_0 = arith.constant 0 : i32
    return %arg0, %c0_i32 : i32, i32
  }
}

</mosaic_0001>

<bundles_post_ra>
// kernel: cnn_forward.3
= control target key start
LH: loop header
LB: loop body
LE: loop exit
PB: predicated region body
PF: predicated region fallthrough
CT: control target
= control target key end

     0   :  { %vm27_vm0 = vcmask 1040384   ;;  %vm813_vm1 = vmmov 1   ;;  %v814_v3 = vmov 0.0   ;;  %v815_v8 = vmov 0   ;;  %s1012_s0 = inlined_call_operand.vmem [shape: f32[4,9,512], index: 0, kind: input, shape index: {}]   ;;  %s1013_s1 = inlined_call_operand.vmem [shape: f32[8,9], index: 1, kind: input, shape index: {}]   ;;  %s1014_s2 = inlined_call_operand.vmem [shape: f32[8,1], index: 2, kind: input, shape index: {}]   ;;  %s1015_s3 = inlined_call_operand.vmem [shape: f32[8,512], index: 3, kind: output, shape index: {}]  }
   0x1   :  { %v16_v0 = vld [vmem:[%s1012_s0 + $0x8] sm:$0xff]  ;;  %vm842_vm2 = vmpackc.low %vm27_vm0, %vm813_vm1  ;;  %104 = vmatprep.mubr.f32.mxu0 %v814_v3  ;;  %175 = vmatprep.mubr.f32.mxu1 %v814_v3  ;;  %v18_v5 = vld [vmem:[%s1012_s0 + $0x18] sm:$0xff]  ;;  %vm23_vm3 = vcmask 72704  }
   0x2   :  { %v20_v1 = vld [vmem:[%s1012_s0 + $0x28] sm:$0x1]  ;;  %v22_v6 = vld [vmem:[%s1012_s0 + $0x38] sm:$0x1]  ;;  %v15_v7 = vld [vmem:[%s1012_s0] sm:$0xff]  ;;  %812 = vset.pattern.permute.xlu0 %v815_v8 }
   0x3   :  { %v761_v4 = vpack.c.bf16 %v20_v1, %v16_v0  ;;  %v767_v9 = vpack.c.bf16 %v22_v6, %v18_v5  ;;  %v19_v10 = vld [vmem:[%s1012_s0 + $0x20] sm:$0x1]  ;;  %v17_v11 = vld [vmem:[%s1012_s0 + $0x10] sm:$0xff]  ;;  %v720_v16 = vld [vmem:[%s1012_s0 + $0x48] sm:$0xff] }
   0x4   :  { %v21_v12 = vld [vmem:[%s1012_s0 + $0x30] sm:$0x1]  ;;  %v764_v13 = vpack.c.bf16 %v19_v10, %v15_v7  ;;  %v871_v15 = vld [vmem:[%s1013_s1] sm:$0xff]  ;;  %v724_v17 = vld [vmem:[%s1012_s0 + $0x68] sm:$0x1] }
   0x5   :  { %763 = vmatprep.subr.msk.bf16.mxu0 %vm842_vm2, %v761_v4  ;;  %v770_v14 = vpack.c.bf16 %v21_v12, %v17_v11  ;;  %769 = vmatprep.subr.msk.bf16.mxu1 %vm842_vm2, %v767_v9  ;;  %v773_v18 = vpack.c.bf16 %v724_v17, %v720_v16  ;;  %v722_v19 = vld [vmem:[%s1012_s0 + $0x58] sm:$0xff]  ;;  %v719_v21 = vld [vmem:[%s1012_s0 + $0x40] sm:$0xff]  ;;  %v721_v24 = vld [vmem:[%s1012_s0 + $0x50] sm:$0xff] }
   0x6   :  { %v726_v20 = vld [vmem:[%s1012_s0 + $0x78] sm:$0x1]  ;;  %766 = vmatpush1.bf16.msk.msra.mxu0 %vm842_vm2, %v764_v13  ;;  %v723_v23 = vld [vmem:[%s1012_s0 + $0x60] sm:$0x1]  ;;  %v725_v25 = vld [vmem:[%s1012_s0 + $0x70] sm:$0x1] }
   0x7   :  { %772 = vmatpush1.bf16.msk.msra.mxu1 %vm842_vm2, %v770_v14  ;;  %v779_v22 = vpack.c.bf16 %v726_v20, %v722_v19  ;;  %775 = vmatprep.subr.msk.bf16.mxu0 %vm842_vm2, %v773_v18  ;;  %v776_v26 = vpack.c.bf16 %v723_v23, %v719_v21  ;;  %v782_v27 = vpack.c.bf16 %v725_v25, %v721_v24  ;;  %v734_v28 = vld [vmem:[%s1012_s0 + $0x88] sm:$0xff]  ;;  %v736_v30 = vld [vmem:[%s1012_s0 + $0x98] sm:$0xff]  ;;  %v733_v33 = vld [vmem:[%s1012_s0 + $0x80] sm:$0xff] }
   0x8   :  { %v738_v29 = vld [vmem:[%s1012_s0 + $0xa8] sm:$0x1]  ;;  %v740_v32 = vld [vmem:[%s1012_s0 + $0xb8] sm:$0x1]  ;;  %v737_v34 = vld [vmem:[%s1012_s0 + $0xa0] sm:$0x1] }
   0x9   :  { %781 = vmatprep.subr.msk.bf16.mxu1 %vm842_vm2, %v779_v22  ;;  %v785_v31 = vpack.c.bf16 %v738_v29, %v734_v28  ;;  %715 = vmatmul.mubr.msk.f32.vlgmr.msra.gmra.mrb[0].mxu0 %vm23_vm3, %v871_v15  ;;  %v791_v35 = vpack.c.bf16 %v740_v32, %v736_v30  ;;  %v735_v36 = vld [vmem:[%s1012_s0 + $0x90] sm:$0xff]  ;;  %v748_v38 = vld [vmem:[%s1012_s0 + $0xc8] sm:$0xff]  ;;  %v788_v39 = vpack.c.bf16 %v737_v34, %v733_v33  ;;  %v750_v42 = vld [vmem:[%s1012_s0 + $0xd8] sm:$0xff] }
   0xa   :  { %718 = vmatmul.mubr.msk.f32.vlgmr.msra.gmra.mrb[0].mxu1 %vm23_vm3, %v871_v15  ;;  %v739_v37 = vld [vmem:[%s1012_s0 + $0xb0] sm:$0x1]  ;;  %778 = vmatpush1.bf16.msk.msra.mxu0 %vm842_vm2, %v776_v26  ;;  %v752_v41 = vld [vmem:[%s1012_s0 + $0xe8] sm:$0x1]  ;;  %v754_v43 = vld [vmem:[%s1012_s0 + $0xf8] sm:$0x1] }
   0xb   :  { %784 = vmatpush1.bf16.msk.msra.mxu1 %vm842_vm2, %v782_v27  ;;  %v794_v40 = vpack.c.bf16 %v739_v37, %v735_v36  ;;  %267 = vmatprep.mubr.f32.mxu0 %v814_v3  ;;  %v747_v44 = vld [vmem:[%s1012_s0 + $0xc0] sm:$0xff]  ;;  %v749_v46 = vld [vmem:[%s1012_s0 + $0xd0] sm:$0xff]  ;;  %v797_v47 = vpack.c.bf16 %v752_v41, %v748_v38  ;;  %v803_v48 = vpack.c.bf16 %v754_v43, %v750_v42 }
   0xc   :  { %338 = vmatprep.mubr.f32.mxu1 %v814_v3  ;;  %v751_v45 = vld [vmem:[%s1012_s0 + $0xe0] sm:$0x1]  ;;  %787 = vmatprep.subr.msk.bf16.mxu0 %vm842_vm2, %v785_v31  ;;  %v753_v49 = vld [vmem:[%s1012_s0 + $0xf0] sm:$0x1] }
   0xd   :  { %793 = vmatprep.subr.msk.bf16.mxu1 %vm842_vm2, %v791_v35  ;;  %729 = vmatmul.mubr.msk.f32.vlgmr.msra.gmra.mrb[2].mxu0 %vm23_vm3, %v871_v15  ;;  %v800_v50 = vpack.c.bf16 %v751_v45, %v747_v44  ;;  %v806_v51 = vpack.c.bf16 %v753_v49, %v749_v46  ;;  %v683_v52 = vld [vmem:[%s1014_s2] sm:$0xff] }
   0xe   :  { %732 = vmatmul.mubr.msk.f32.vlgmr.msra.gmra.mrb[2].mxu1 %vm23_vm3, %v871_v15  ;;  %790 = vmatpush1.bf16.msk.msra.mxu0 %vm842_vm2, %v788_v39 }
   0xf   :  { %796 = vmatpush1.bf16.msk.msra.mxu1 %vm842_vm2, %v794_v40  ;;  %434 = vmatprep.mubr.f32.mxu0 %v814_v3 }
  0x10   :  { %505 = vmatprep.mubr.f32.mxu1 %v814_v3  ;;  %799 = vmatprep.subr.msk.bf16.mxu0 %vm842_vm2, %v797_v47 }
  0x11   :  { %805 = vmatprep.subr.msk.bf16.mxu1 %vm842_vm2, %v803_v48  ;;  %743 = vmatmul.mubr.msk.f32.vlgmr.msra.gmra.mrb[4].mxu0 %vm23_vm3, %v871_v15 }
  0x12   :  { %746 = vmatmul.mubr.msk.f32.vlgmr.msra.gmra.mrb[4].mxu1 %vm23_vm3, %v871_v15  ;;  %802 = vmatpush1.bf16.msk.msra.mxu0 %vm842_vm2, %v800_v50 }
  0x13   :  { %808 = vmatpush1.bf16.msk.msra.mxu1 %vm842_vm2, %v806_v51  ;;  %601 = vmatprep.mubr.f32.mxu0 %v814_v3 }
  0x14   :  { %672 = vmatprep.mubr.f32.mxu1 %v814_v3  ;;  %686 = vperm.xlu0 %812, %v683_v52  }
  0x15   :  { %757 = vmatmul.mubr.msk.f32.vlgmr.msra.gmra.mrb[6].mxu0 %vm23_vm3, %v871_v15 }
  0x16   :  { %760 = vmatmul.mubr.msk.f32.vlgmr.msra.gmra.mrb[6].mxu1 %vm23_vm3, %v871_v15 }
  0x93   :  { %v687_v9 = vpop.permute.xlu0 %686 }
  0xdc   :  { %v106_v53 = vpop.f32.mrb[0].mxu0 }
  0xdd   :  { %v177_v54 = vpop.f32.mrb[0].mxu1  ;;  %v108_v55 = vpop.f32.mrb[1].mxu0 }
  0xde   :  { %v179_v56 = vpop.f32.mrb[1].mxu1 }
  0xe0   :  { %v269_v57 = vpop.f32.mrb[2].mxu0 }
  0xe1   :  { %v340_v58 = vpop.f32.mrb[2].mxu1  ;;  %v345_v59 = vmax.f32 %v106_v53, %v269_v57  ;;  %v271_v61 = vpop.f32.mrb[3].mxu0 }
  0xe2   :  { %v347_v60 = vmax.f32 %v177_v54, %v340_v58  ;;  %v342_v62 = vpop.f32.mrb[3].mxu1  ;;  %v346_v63 = vmax.f32 %v108_v55, %v271_v61 }
  0xe3   :  { %v348_v0 = vmax.f32 %v179_v56, %v342_v62 }
  0xe4   :  { %v436_v1 = vpop.f32.mrb[4].mxu0 }
  0xe5   :  { %v507_v2 = vpop.f32.mrb[4].mxu1  ;;  %v512_v3 = vmax.f32 %v345_v59, %v436_v1  ;;  %v438_v5 = vpop.f32.mrb[5].mxu0 }
  0xe6   :  { %v514_v4 = vmax.f32 %v347_v60, %v507_v2  ;;  %v509_v6 = vpop.f32.mrb[5].mxu1  ;;  %v513_v7 = vmax.f32 %v346_v63, %v438_v5 }
  0xe7   :  { %v515_v8 = vmax.f32 %v348_v0, %v509_v6 }
  0xe8   :  { %v603_v10 = vpop.f32.mrb[6].mxu0 }
  0xe9   :  { %v674_v11 = vpop.f32.mrb[6].mxu1  ;;  %v679_v12 = vmax.f32 %v512_v3, %v603_v10  ;;  %v605_v14 = vpop.f32.mrb[7].mxu0 }
  0xea   :  { %v681_v13 = vmax.f32 %v514_v4, %v674_v11  ;;  %v676_v15 = vpop.f32.mrb[7].mxu1  ;;  %v680_v16 = vmax.f32 %v513_v7, %v605_v14 }
  0xeb   :  { %v682_v17 = vmax.f32 %v515_v8, %v676_v15  ;;  %v689_v18 = vadd.f32 %v687_v9, %v679_v12 }
  0xec   :  { %v691_v19 = vadd.f32 %v687_v9, %v681_v13  ;;  %v690_v20 = vadd.f32 %v687_v9, %v680_v16 }
  0xed   :  { %v692_v21 = vadd.f32 %v687_v9, %v682_v17  ;;  %vm693_vm4 = vcmp.ge.f32.partialorder %v689_v18, 0.0  ;;  %v697_v22 = vmul.f32 0.01, %v689_v18 }
  0xee   :  { %vm695_vm5 = vcmp.ge.f32.partialorder %v691_v19, 0.0  ;;  %v699_v23 = vmul.f32 0.01, %v691_v19  ;;  %vm694_vm6 = vcmp.ge.f32.partialorder %v690_v20, 0.0  ;;  %v698_v24 = vmul.f32 0.01, %v690_v20 }
  0xef   :  { %vm696_vm7 = vcmp.ge.f32.partialorder %v692_v21, 0.0  ;;  %v700_v25 = vmul.f32 0.01, %v692_v21  ;;  %v701_v26 = vsel %vm693_vm4, %v689_v18, %v697_v22 }
  0xf0   :  { %v703_v27 = vsel %vm695_vm5, %v691_v19, %v699_v23  ;;  %v702_v28 = vsel %vm694_vm6, %v690_v20, %v698_v24  ;;  %705 = vst [vmem:[%s1015_s3] sm:$0xff] %v701_v26 }
  0xf1   :  { %v704_v29 = vsel %vm696_vm7, %v692_v21, %v700_v25  ;;  %707 = vst [vmem:[%s1015_s3 + $0x10] sm:$0xff] %v703_v27  ;;  %706 = vst [vmem:[%s1015_s3 + $0x8] sm:$0xff] %v702_v28 }
  0xf2   :  { %708 = vst [vmem:[%s1015_s3 + $0x18] sm:$0xff] %v704_v29 }

// kernel: cnn_forward.4
= control target key start
LH: loop header
LB: loop body
LE: loop exit
PB: predicated region body
PF: predicated region fallthrough
CT: control target
= control target key end

     0   :  { %v623_v3 = vmov 0   ;;  %vm25_vm0 = vcmask 588800   ;;  %s778_s0 = inlined_call_operand.vmem [shape: f32[4,72,128], index: 0, kind: input, shape index: {}]   ;;  %s779_s1 = inlined_call_operand.vmem [shape: f32[16,72], index: 1, kind: input, shape index: {}]   ;;  %s780_s2 = inlined_call_operand.vmem [shape: f32[16,1], index: 2, kind: input, shape index: {}]   ;;  %s781_s3 = inlined_call_operand.vmem [shape: f32[16,128], index: 3, kind: output, shape index: {}]  }
   0x1   :  { %v16_v0 = vld [vmem:[%s778_s0] sm:$0xff]  ;;  %v17_v1 = vld [vmem:[%s778_s0 + $0x8] sm:$0xff]  ;;  %622 = vset.pattern.permute.xlu0 %v623_v3  ;;  %v397_v5 = vld [vmem:[%s778_s0 + $0x50] sm:$0xff] }
   0x2   :  { %v396_v2 = vld [vmem:[%s778_s0 + $0x48] sm:$0xff]  ;;  %v557_v4 = vpack.c.bf16 %v17_v1, %v16_v0  ;;  %v18_v6 = vld [vmem:[%s778_s0 + $0x10] sm:$0xff]  ;;  %v19_v7 = vld [vmem:[%s778_s0 + $0x18] sm:$0xff] }
   0x3   :  { %v573_v8 = vpack.c.bf16 %v397_v5, %v396_v2  ;;  %v561_v9 = vpack.c.bf16 %v19_v7, %v18_v6  ;;  %v398_v10 = vld [vmem:[%s778_s0 + $0x58] sm:$0xff]  ;;  %v399_v11 = vld [vmem:[%s778_s0 + $0x60] sm:$0xff]  ;;  %v21_v14 = vld [vmem:[%s778_s0 + $0x28] sm:$0xff] }
   0x4   :  { %v20_v12 = vld [vmem:[%s778_s0 + $0x20] sm:$0xff]  ;;  %558 = vmatprep.subr.bf16.mxu0 %v557_v4  ;;  %v577_v13 = vpack.c.bf16 %v399_v11, %v398_v10  ;;  %v400_v15 = vld [vmem:[%s778_s0 + $0x68] sm:$0xff]  ;;  %v401_v16 = vld [vmem:[%s778_s0 + $0x70] sm:$0xff] }
   0x5   :  { %574 = vmatprep.subr.bf16.mxu1 %v573_v8  ;;  %560 = vmatpush3.bf16.msra.mxu0 %v557_v4  ;;  %v565_v17 = vpack.c.bf16 %v21_v14, %v20_v12  ;;  %v581_v18 = vpack.c.bf16 %v401_v16, %v400_v15  ;;  %v22_v19 = vld [vmem:[%s778_s0 + $0x30] sm:$0xff]  ;;  %v23_v20 = vld [vmem:[%s778_s0 + $0x38] sm:$0xff]  ;;  %v14_v21 = vld [vmem:[%s779_s1] sm:$0xff] }
   0x6   :  { %576 = vmatpush3.bf16.msra.mxu1 %v573_v8  ;;  %562 = vmatprep.subr.bf16.mxu0 %v561_v9  ;;  %v402_v22 = vld [vmem:[%s778_s0 + $0x78] sm:$0xff]  ;;  %v403_v23 = vld [vmem:[%s778_s0 + $0x80] sm:$0xff]  ;;  %v569_v24 = vpack.c.bf16 %v23_v20, %v22_v19  ;;  %v404_v28 = vld [vmem:[%s778_s0 + $0x88] sm:$0xff] }
   0x7   :  { %578 = vmatprep.subr.bf16.mxu1 %v577_v13  ;;  %491 = vmatprep.mubr.msk.f32.mxu0 %vm25_vm0, %v14_v21  ;;  %v585_v25 = vpack.c.bf16 %v403_v23, %v402_v22  ;;  %v368_v26 = vld [vmem:[%s780_s2] sm:$0xff]  ;;  %v407_v29 = vld [vmem:[%s778_s0 + $0x90] sm:$0xff]  ;;  %v408_v30 = vld [vmem:[%s778_s0 + $0x98] sm:$0xff] }
   0x8   :  { %512 = vmatprep.mubr.msk.f32.mxu1 %vm25_vm0, %v14_v21  ;;  %v24_v27 = vld [vmem:[%s778_s0 + $0x40] sm:$0xff]  ;;  %372 = vperm.xlu0 %622, %v368_v26   ;;  %v369_v31 = vld [vmem:[%s780_s2 + $0x8] sm:$0xff]  ;;  %v418_v32 = vld [vmem:[%s778_s0 + $0xd8] sm:$0xff]  ;;  %v589_v37 = vpack.c.bf16 %v408_v30, %v407_v29 }
   0x9   :  { %564 = vmatpush3.bf16.msra.mxu0 %v561_v9  ;;  %v419_v33 = vld [vmem:[%s778_s0 + $0xe0] sm:$0xff]  ;;  %v410_v35 = vld [vmem:[%s778_s0 + $0xa8] sm:$0xff]  ;;  %v421_v39 = vld [vmem:[%s778_s0 + $0xf0] sm:$0xff] }
   0xa   :  { %580 = vmatpush3.bf16.msra.mxu1 %v577_v13  ;;  %566 = vmatprep.subr.bf16.mxu0 %v565_v17  ;;  %v409_v34 = vld [vmem:[%s778_s0 + $0xa0] sm:$0xff]  ;;  %v15_v36 = vld [vmem:[%s779_s1 + $0x8] sm:$0xff]  ;;  %v605_v40 = vpack.c.bf16 %v419_v33, %v418_v32  ;;  %v411_v43 = vld [vmem:[%s778_s0 + $0xb0] sm:$0xff] }
   0xb   :  { %582 = vmatprep.subr.bf16.mxu1 %v581_v18  ;;  %v420_v38 = vld [vmem:[%s778_s0 + $0xe8] sm:$0xff]  ;;  %v593_v41 = vpack.c.bf16 %v410_v35, %v409_v34  ;;  %v412_v44 = vld [vmem:[%s778_s0 + $0xb8] sm:$0xff]  ;;  %v423_v46 = vld [vmem:[%s778_s0 + $0x100] sm:$0xff] }
   0xc   :  { %377 = vperm.xlu0 %622, %v369_v31   ;;  %v609_v42 = vpack.c.bf16 %v421_v39, %v420_v38  ;;  %v422_v45 = vld [vmem:[%s778_s0 + $0xf8] sm:$0xff]  ;;  %v597_v47 = vpack.c.bf16 %v412_v44, %v411_v43  ;;  %v413_v49 = vld [vmem:[%s778_s0 + $0xc0] sm:$0xff]  ;;  %v414_v50 = vld [vmem:[%s778_s0 + $0xc8] sm:$0xff] }
   0xd   :  { %568 = vmatpush3.bf16.msra.mxu0 %v565_v17  ;;  %v613_v48 = vpack.c.bf16 %v423_v46, %v422_v45  ;;  %v424_v51 = vld [vmem:[%s778_s0 + $0x108] sm:$0xff]  ;;  %v425_v52 = vld [vmem:[%s778_s0 + $0x110] sm:$0xff]  ;;  %v601_v53 = vpack.c.bf16 %v414_v50, %v413_v49  ;;  %v426_v56 = vld [vmem:[%s778_s0 + $0x118] sm:$0xff] }
   0xe   :  { %584 = vmatpush3.bf16.msra.mxu1 %v581_v18  ;;  %570 = vmatprep.subr.bf16.mxu0 %v569_v24  ;;  %v617_v54 = vpack.c.bf16 %v425_v52, %v424_v51  ;;  %v415_v55 = vld [vmem:[%s778_s0 + $0xd0] sm:$0xff] }
   0xf   :  { %586 = vmatprep.subr.bf16.mxu1 %v585_v25 }
  0x11   :  { %572 = vmatpush3.bf16.msra.mxu0 %v569_v24 }
  0x12   :  { %588 = vmatpush3.bf16.msra.mxu1 %v585_v25  ;;  %489 = vmatprep.subr.mxu0 %v24_v27 }
  0x13   :  { %510 = vmatprep.subr.mxu1 %v404_v28 }
  0x15   :  { %490 = vmatpush3.msra.mxu0 %v24_v27 }
  0x16   :  { %511 = vmatpush3.msra.mxu1 %v404_v28  ;;  %492 = vmatmul.mubr.msk.f32.vlgmr.msra.gmra.mrb[0].mxu0 %vm25_vm0, %v15_v36 }
  0x17   :  { %513 = vmatmul.mubr.msk.f32.vlgmr.msra.gmra.mrb[0].mxu1 %vm25_vm0, %v15_v36  ;;  %590 = vmatprep.subr.bf16.mxu0 %v589_v37 }
  0x18   :  { %592 = vmatpush3.bf16.msra.mxu0 %v589_v37  ;;  %606 = vmatprep.subr.bf16.mxu1 %v605_v40 }
  0x19   :  { %608 = vmatpush3.bf16.msra.mxu1 %v605_v40  ;;  %594 = vmatprep.subr.bf16.mxu0 %v593_v41 }
  0x1a   :  { %610 = vmatprep.subr.bf16.mxu1 %v609_v42  ;;  %533 = vmatprep.mubr.msk.f32.mxu0 %vm25_vm0, %v14_v21 }
  0x1b   :  { %554 = vmatprep.mubr.msk.f32.mxu1 %vm25_vm0, %v14_v21 }
  0x1c   :  { %596 = vmatpush3.bf16.msra.mxu0 %v593_v41 }
  0x1d   :  { %612 = vmatpush3.bf16.msra.mxu1 %v609_v42  ;;  %598 = vmatprep.subr.bf16.mxu0 %v597_v47 }
  0x1e   :  { %614 = vmatprep.subr.bf16.mxu1 %v613_v48 }
  0x20   :  { %600 = vmatpush3.bf16.msra.mxu0 %v597_v47 }
  0x21   :  { %616 = vmatpush3.bf16.msra.mxu1 %v613_v48  ;;  %602 = vmatprep.subr.bf16.mxu0 %v601_v53 }
  0x22   :  { %618 = vmatprep.subr.bf16.mxu1 %v617_v54 }
  0x24   :  { %604 = vmatpush3.bf16.msra.mxu0 %v601_v53 }
  0x25   :  { %620 = vmatpush3.bf16.msra.mxu1 %v617_v54  ;;  %531 = vmatprep.subr.mxu0 %v415_v55 }
  0x26   :  { %552 = vmatprep.subr.mxu1 %v426_v56 }
  0x28   :  { %532 = vmatpush3.msra.mxu0 %v415_v55 }
  0x29   :  { %534 = vmatmul.mubr.msk.f32.vlgmr.msra.gmra.mrb[2].mxu0 %vm25_vm0, %v15_v36  ;;  %553 = vmatpush3.msra.mxu1 %v426_v56 }
  0x2a   :  { %555 = vmatmul.mubr.msk.f32.vlgmr.msra.gmra.mrb[2].mxu1 %vm25_vm0, %v15_v36 }
  0x87   :  { %v373_v63 = vpop.permute.xlu0 %372 }
  0x8b   :  { %v378_v7 = vpop.permute.xlu0 %377 }
  0xe9   :  { %v493_v57 = vpop.f32.mrb[0].mxu0 }
  0xea   :  { %v514_v58 = vpop.f32.mrb[0].mxu1  ;;  %v98_v59 = vpop.f32.mrb[1].mxu0 }
  0xeb   :  { %v193_v60 = vmax.f32 %v493_v57, %v514_v58  ;;  %v183_v61 = vpop.f32.mrb[1].mxu1 }
  0xec   :  { %v192_v62 = vmax.f32 %v98_v59, %v183_v61 }
  0xfc   :  { %v535_v0 = vpop.f32.mrb[2].mxu0 }
  0xfd   :  { %v280_v1 = vmax.f32 %v193_v60, %v535_v0  ;;  %v270_v2 = vpop.f32.mrb[3].mxu0  ;;  %v556_v3 = vpop.f32.mrb[2].mxu1 }
  0xfe   :  { %v279_v4 = vmax.f32 %v192_v62, %v270_v2  ;;  %v357_v5 = vpop.f32.mrb[3].mxu1 }
  0xff   :  { %v367_v6 = vmax.f32 %v280_v1, %v556_v3 }
 0x100   :  { %v366_v8 = vmax.f32 %v279_v4, %v357_v5 }
 0x101   :  { %v381_v9 = vadd.f32 %v378_v7, %v367_v6 }
 0x102   :  { %v380_v10 = vadd.f32 %v373_v63, %v366_v8 }
 0x103   :  { %vm383_vm1 = vcmp.ge.f32.partialorder %v381_v9, 0.0  ;;  %v385_v11 = vmul.f32 0.01, %v381_v9 }
 0x104   :  { %vm382_vm2 = vcmp.ge.f32.partialorder %v380_v10, 0.0  ;;  %v384_v12 = vmul.f32 0.01, %v380_v10 }
 0x105   :  { %v387_v13 = vsel %vm383_vm1, %v381_v9, %v385_v11 }
 0x106   :  { %389 = vst [vmem:[%s781_s3 + $0x8] sm:$0xff] %v387_v13  ;;  %v386_v14 = vsel %vm382_vm2, %v380_v10, %v384_v12 }
 0x107   :  { %388 = vst [vmem:[%s781_s3] sm:$0xff] %v386_v14 }

// kernel: cnn_forward.5
= control target key start
LH: loop header
LB: loop body
LE: loop exit
PB: predicated region body
PF: predicated region fallthrough
CT: control target
= control target key end

     0   :  { %vm635_vm0 = vmmov 0   ;;  %vm126_vm1 = vcmask 130048   ;;  %s978_s1 = inlined_call_operand.vmem [shape: f32[784,128], index: 1, kind: input, shape index: {}]   ;;  %s979_s0 = inlined_call_operand.vmem [shape: f32[8,784], index: 0, kind: input, shape index: {}]   ;;  %s980_s2 = inlined_call_operand.vmem [shape: f32[1,128], index: 2, kind: input, shape index: {}]   ;;  %s981_s3 = inlined_call_operand.vmem [shape: f32[8,128], index: 3, kind: output, shape index: {}]  }
   0x1   :  { %v37_v0 = vld [vmem:[%s978_s1 + $0x80] sm:$0xff]  ;;  %v38_v1 = vld [vmem:[%s978_s1 + $0x88] sm:$0xff]  ;;  %v39_v11 = vld [vmem:[%s978_s1 + $0x90] sm:$0xff] }
   0x2   :  { %v21_v2 = vld [vmem:[%s978_s1] sm:$0xff]  ;;  %v532_v3 = vpack.c.bf16 %v38_v1, %v37_v0  ;;  %v22_v4 = vld [vmem:[%s978_s1 + $0x8] sm:$0xff]  ;;  %v40_v13 = vld [vmem:[%s978_s1 + $0x98] sm:$0xff] }
   0x3   :  { %v69_v5 = vld [vmem:[%s978_s1 + $0x180] sm:$0xff]  ;;  %v70_v6 = vld [vmem:[%s978_s1 + $0x188] sm:$0xff]  ;;  %v534_v7 = vpack.c.bf16 %v22_v4, %v21_v2  ;;  %v23_v14 = vld [vmem:[%s978_s1 + $0x10] sm:$0xff]  ;;  %v536_v16 = vpack.c.bf16 %v40_v13, %v39_v11 }
   0x4   :  { %v564_v8 = vpack.c.bf16 %v70_v6, %v69_v5  ;;  %v53_v9 = vld [vmem:[%s978_s1 + $0x100] sm:$0xff]  ;;  %v54_v10 = vld [vmem:[%s978_s1 + $0x108] sm:$0xff]  ;;  %533 = vmatprep.subr.bf16.mxu0 %v532_v3  ;;  %v24_v15 = vld [vmem:[%s978_s1 + $0x18] sm:$0xff] }
   0x5   :  { %v566_v12 = vpack.c.bf16 %v54_v10, %v53_v9  ;;  %535 = vmatpush3.bf16.msra.mxu0 %v534_v7  ;;  %v538_v17 = vpack.c.bf16 %v24_v15, %v23_v14  ;;  %v71_v18 = vld [vmem:[%s978_s1 + $0x190] sm:$0xff]  ;;  %v72_v19 = vld [vmem:[%s978_s1 + $0x198] sm:$0xff]  ;;  %v41_v23 = vld [vmem:[%s978_s1 + $0xa0] sm:$0xff] }
   0x6   :  { %565 = vmatprep.subr.bf16.mxu1 %v564_v8  ;;  %v55_v20 = vld [vmem:[%s978_s1 + $0x110] sm:$0xff]  ;;  %v568_v21 = vpack.c.bf16 %v72_v19, %v71_v18  ;;  %v56_v22 = vld [vmem:[%s978_s1 + $0x118] sm:$0xff]  ;;  %v42_v24 = vld [vmem:[%s978_s1 + $0xa8] sm:$0xff]  ;;  %537 = vmatprep.subr.bf16.mxu0 %v536_v16 }
   0x7   :  { %567 = vmatpush3.bf16.msra.mxu1 %v566_v12  ;;  %v570_v25 = vpack.c.bf16 %v56_v22, %v55_v20  ;;  %v540_v26 = vpack.c.bf16 %v42_v24, %v41_v23  ;;  %v25_v27 = vld [vmem:[%s978_s1 + $0x20] sm:$0xff]  ;;  %v26_v28 = vld [vmem:[%s978_s1 + $0x28] sm:$0xff]  ;;  %v43_v35 = vld [vmem:[%s978_s1 + $0xb0] sm:$0xff] }
   0x8   :  { %v73_v29 = vld [vmem:[%s978_s1 + $0x1a0] sm:$0xff]  ;;  %569 = vmatprep.subr.bf16.mxu1 %v568_v21  ;;  %v74_v30 = vld [vmem:[%s978_s1 + $0x1a8] sm:$0xff]  ;;  %v542_v33 = vpack.c.bf16 %v26_v28, %v25_v27  ;;  %v44_v36 = vld [vmem:[%s978_s1 + $0xb8] sm:$0xff] }
   0x9   :  { %v57_v31 = vld [vmem:[%s978_s1 + $0x120] sm:$0xff]  ;;  %v58_v32 = vld [vmem:[%s978_s1 + $0x128] sm:$0xff]  ;;  %539 = vmatpush3.bf16.msra.mxu0 %v538_v17  ;;  %v572_v34 = vpack.c.bf16 %v74_v30, %v73_v29  ;;  %v27_v37 = vld [vmem:[%s978_s1 + $0x30] sm:$0xff]  ;;  %v544_v39 = vpack.c.bf16 %v44_v36, %v43_v35 }
   0xa   :  { %541 = vmatprep.subr.bf16.mxu0 %v540_v26  ;;  %v574_v38 = vpack.c.bf16 %v58_v32, %v57_v31  ;;  %v28_v40 = vld [vmem:[%s978_s1 + $0x38] sm:$0xff]  ;;  %v75_v41 = vld [vmem:[%s978_s1 + $0x1b0] sm:$0xff]  ;;  %v45_v46 = vld [vmem:[%s978_s1 + $0xc0] sm:$0xff] }
   0xb   :  { %571 = vmatpush3.bf16.msra.mxu1 %v570_v25  ;;  %v76_v42 = vld [vmem:[%s978_s1 + $0x1b8] sm:$0xff]  ;;  %v59_v44 = vld [vmem:[%s978_s1 + $0x130] sm:$0xff]  ;;  %v46_v47 = vld [vmem:[%s978_s1 + $0xc8] sm:$0xff]  ;;  %v546_v48 = vpack.c.bf16 %v28_v40, %v27_v37 }
   0xc   :  { %573 = vmatprep.subr.bf16.mxu1 %v572_v34  ;;  %v576_v43 = vpack.c.bf16 %v76_v42, %v75_v41  ;;  %v60_v45 = vld [vmem:[%s978_s1 + $0x138] sm:$0xff]  ;;  %v77_v49 = vld [vmem:[%s978_s1 + $0x1c0] sm:$0xff]  ;;  %v78_v50 = vld [vmem:[%s978_s1 + $0x1c8] sm:$0xff]  ;;  %v548_v52 = vpack.c.bf16 %v46_v47, %v45_v46 }
   0xd   :  { %543 = vmatpush3.bf16.msra.mxu0 %v542_v33  ;;  %v578_v51 = vpack.c.bf16 %v60_v45, %v59_v44  ;;  %v29_v53 = vld [vmem:[%s978_s1 + $0x40] sm:$0xff]  ;;  %v30_v54 = vld [vmem:[%s978_s1 + $0x48] sm:$0xff]  ;;  %v580_v56 = vpack.c.bf16 %v78_v50, %v77_v49  ;;  %v47_v58 = vld [vmem:[%s978_s1 + $0xd0] sm:$0xff]  ;;  %v634_v50 = vmov 0.0|0.0  }
   0xe   :  { %545 = vmatprep.subr.bf16.mxu0 %v544_v39  ;;  %v61_v55 = vld [vmem:[%s978_s1 + $0x140] sm:$0xff]  ;;  %v62_v57 = vld [vmem:[%s978_s1 + $0x148] sm:$0xff]  ;;  %v48_v59 = vld [vmem:[%s978_s1 + $0xd8] sm:$0xff]  ;;  %v550_v62 = vpack.c.bf16 %v30_v54, %v29_v53 }
   0xf   :  { %575 = vmatpush3.bf16.msra.mxu1 %v574_v38  ;;  %v79_v60 = vld [vmem:[%s978_s1 + $0x1d0] sm:$0xff]  ;;  %v80_v61 = vld [vmem:[%s978_s1 + $0x1d8] sm:$0xff]  ;;  %v582_v63 = vpack.c.bf16 %v62_v57, %v61_v55  ;;  %v552_v0 = vpack.c.bf16 %v48_v59, %v47_v58  ;;  %v49_v6 = vld [vmem:[%s978_s1 + $0xe0] sm:$0xff] }
  0x10   :  { %577 = vmatprep.subr.bf16.mxu1 %v576_v43  ;;  %v31_v1 = vld [vmem:[%s978_s1 + $0x50] sm:$0xff]  ;;  %v32_v2 = vld [vmem:[%s978_s1 + $0x58] sm:$0xff]  ;;  %v584_v4 = vpack.c.bf16 %v80_v61, %v79_v60  ;;  %v50_v7 = vld [vmem:[%s978_s1 + $0xe8] sm:$0xff]  ;;  %v636_v60 = vmov 0.0  }
  0x11   :  { %547 = vmatpush3.bf16.msra.mxu0 %v546_v48  ;;  %v63_v3 = vld [vmem:[%s978_s1 + $0x150] sm:$0xff]  ;;  %v64_v5 = vld [vmem:[%s978_s1 + $0x158] sm:$0xff]  ;;  %v81_v8 = vld [vmem:[%s978_s1 + $0x1e0] sm:$0xff]  ;;  %v554_v10 = vpack.c.bf16 %v32_v2, %v31_v1  ;;  %v556_v14 = vpack.c.bf16 %v50_v7, %v49_v6 }
  0x12   :  { %549 = vmatprep.subr.bf16.mxu0 %v548_v52  ;;  %v82_v9 = vld [vmem:[%s978_s1 + $0x1e8] sm:$0xff]  ;;  %v33_v11 = vld [vmem:[%s978_s1 + $0x60] sm:$0xff]  ;;  %v586_v13 = vpack.c.bf16 %v64_v5, %v63_v3  ;;  %v51_v19 = vld [vmem:[%s978_s1 + $0xf0] sm:$0xff] }
  0x13   :  { %579 = vmatpush3.bf16.msra.mxu1 %v578_v51  ;;  %v15_v12 = vld [vmem:[%s979_s0 + $0x8] sm:$0xff]  ;;  %v65_v16 = vld [vmem:[%s978_s1 + $0x160] sm:$0xff]  ;;  %v588_v18 = vpack.c.bf16 %v82_v9, %v81_v8  ;;  %v52_v20 = vld [vmem:[%s978_s1 + $0xf8] sm:$0xff] }
  0x14   :  { %581 = vmatprep.subr.bf16.mxu1 %v580_v56  ;;  %v34_v15 = vld [vmem:[%s978_s1 + $0x68] sm:$0xff]  ;;  %194 = vmatprep.mubr.f32.mxu0 %v15_v12  ;;  %v17_v21 = vld [vmem:[%s979_s0 + $0x18] sm:$0xff]  ;;  %v83_v22 = vld [vmem:[%s978_s1 + $0x1f0] sm:$0xff]  ;;  %v560_v26 = vpack.c.bf16 %v52_v20, %v51_v19 }
  0x15   :  { %551 = vmatpush3.bf16.msra.mxu0 %v550_v62  ;;  %v66_v17 = vld [vmem:[%s978_s1 + $0x168] sm:$0xff]  ;;  %v84_v23 = vld [vmem:[%s978_s1 + $0x1f8] sm:$0xff]  ;;  %264 = vmatprep.mubr.f32.mxu1 %v17_v21  ;;  %v558_v24 = vpack.c.bf16 %v34_v15, %v33_v11  ;;  %v35_v27 = vld [vmem:[%s978_s1 + $0x70] sm:$0xff] }
  0x16   :  { %553 = vmatprep.subr.bf16.mxu0 %v552_v0  ;;  %v590_v25 = vpack.c.bf16 %v66_v17, %v65_v16  ;;  %v36_v28 = vld [vmem:[%s978_s1 + $0x78] sm:$0xff]  ;;  %v67_v29 = vld [vmem:[%s978_s1 + $0x170] sm:$0xff]  ;;  %v592_v30 = vpack.c.bf16 %v84_v23, %v83_v22  ;;  %v101_v32 = vld [vmem:[%s978_s1 + $0x280] sm:$0xff] }
  0x17   :  { %583 = vmatpush3.bf16.msra.mxu1 %v582_v63  ;;  %v68_v31 = vld [vmem:[%s978_s1 + $0x178] sm:$0xff]  ;;  %v102_v33 = vld [vmem:[%s978_s1 + $0x288] sm:$0xff]  ;;  %v562_v34 = vpack.c.bf16 %v36_v28, %v35_v27  ;;  %v85_v37 = vld [vmem:[%s978_s1 + $0x200] sm:$0xff] }
  0x18   :  { %585 = vmatprep.subr.bf16.mxu1 %v584_v4  ;;  %v594_v35 = vpack.c.bf16 %v68_v31, %v67_v29  ;;  %v596_v36 = vpack.c.bf16 %v102_v33, %v101_v32  ;;  %v86_v38 = vld [vmem:[%s978_s1 + $0x208] sm:$0xff]  ;;  %v103_v39 = vld [vmem:[%s978_s1 + $0x290] sm:$0xff]  ;;  %v104_v40 = vld [vmem:[%s978_s1 + $0x298] sm:$0xff] }
  0x19   :  { %555 = vmatpush3.bf16.msra.mxu0 %v554_v10  ;;  %v14_v41 = vld [vmem:[%s979_s0] sm:$0xff]  ;;  %v598_v42 = vpack.c.bf16 %v86_v38, %v85_v37  ;;  %v16_v43 = vld [vmem:[%s979_s0 + $0x10] sm:$0xff]  ;;  %v600_v45 = vpack.c.bf16 %v104_v40, %v103_v39  ;;  %v88_v46 = vld [vmem:[%s978_s1 + $0x218] sm:$0xff] }
  0x1a   :  { %557 = vmatprep.subr.bf16.mxu0 %v556_v14  ;;  %v87_v44 = vld [vmem:[%s978_s1 + $0x210] sm:$0xff]  ;;  %v105_v47 = vld [vmem:[%s978_s1 + $0x2a0] sm:$0xff]  ;;  %v106_v48 = vld [vmem:[%s978_s1 + $0x2a8] sm:$0xff] }
  0x1b   :  { %587 = vmatpush3.bf16.msra.mxu1 %v586_v13  ;;  %v19_v49 = vld [vmem:[%s979_s0 + $0x28] sm:$0xff]  ;;  %v117_v51 = vld [vmem:[%s978_s1 + $0x300] sm:$0xff]  ;;  %v602_v54 = vpack.c.bf16 %v88_v46, %v87_v44  ;;  %v604_v55 = vpack.c.bf16 %v106_v48, %v105_v47  ;;  %v107_v58 = vld [vmem:[%s978_s1 + $0x2b0] sm:$0xff] }
  0x1c   :  { %589 = vmatprep.subr.bf16.mxu1 %v588_v18  ;;  %v118_v52 = vld [vmem:[%s978_s1 + $0x308] sm:$0xff]  ;;  %v89_v56 = vld [vmem:[%s978_s1 + $0x220] sm:$0xff]  ;;  %v108_v59 = vld [vmem:[%s978_s1 + $0x2b8] sm:$0xff] }
  0x1d   :  { %559 = vmatpush3.bf16.msra.mxu0 %v558_v24  ;;  %v629_v53 = vpack.c.bf16 %v118_v52, %v117_v51  ;;  %v90_v57 = vld [vmem:[%s978_s1 + $0x228] sm:$0xff]  ;;  %v20_v61 = vld [vmem:[%s979_s0 + $0x30] sm:$0xff]  ;;  %v608_v63 = vpack.c.bf16 %v108_v59, %v107_v58  ;;  %v92_v1 = vld [vmem:[%s978_s1 + $0x238] sm:$0xff] }
  0x1e   :  { %561 = vmatprep.subr.bf16.mxu0 %v560_v26  ;;  %v606_v62 = vpack.c.bf16 %v90_v57, %v89_v56  ;;  %v91_v0 = vld [vmem:[%s978_s1 + $0x230] sm:$0xff]  ;;  %v109_v2 = vld [vmem:[%s978_s1 + $0x2c0] sm:$0xff]  ;;  %v110_v3 = vld [vmem:[%s978_s1 + $0x2c8] sm:$0xff] }
  0x1f   :  { %591 = vmatpush3.bf16.msra.mxu1 %v590_v25  ;;  %v610_v4 = vpack.c.bf16 %v92_v1, %v91_v0  ;;  %v612_v5 = vpack.c.bf16 %v110_v3, %v109_v2  ;;  %v93_v6 = vld [vmem:[%s978_s1 + $0x240] sm:$0xff]  ;;  %v94_v7 = vld [vmem:[%s978_s1 + $0x248] sm:$0xff]  ;;  %v111_v8 = vld [vmem:[%s978_s1 + $0x2d0] sm:$0xff] }
  0x20   :  { %593 = vmatprep.subr.bf16.mxu1 %v592_v30  ;;  %v112_v9 = vld [vmem:[%s978_s1 + $0x2d8] sm:$0xff]  ;;  %v614_v10 = vpack.c.bf16 %v94_v7, %v93_v6  ;;  %v95_v12 = vld [vmem:[%s978_s1 + $0x250] sm:$0xff]  ;;  %v113_v14 = vld [vmem:[%s978_s1 + $0x2e0] sm:$0xff] }
  0x21   :  { %563 = vmatpush3.bf16.msra.mxu0 %v562_v34  ;;  %v616_v11 = vpack.c.bf16 %v112_v9, %v111_v8  ;;  %v96_v13 = vld [vmem:[%s978_s1 + $0x258] sm:$0xff]  ;;  %v114_v15 = vld [vmem:[%s978_s1 + $0x2e8] sm:$0xff]  ;;  %v97_v18 = vld [vmem:[%s978_s1 + $0x260] sm:$0xff] }
  0x22   :  { %597 = vmatprep.subr.bf16.mxu0 %v596_v36  ;;  %v618_v16 = vpack.c.bf16 %v96_v13, %v95_v12  ;;  %v620_v17 = vpack.c.bf16 %v114_v15, %v113_v14  ;;  %v98_v19 = vld [vmem:[%s978_s1 + $0x268] sm:$0xff]  ;;  %v115_v20 = vld [vmem:[%s978_s1 + $0x2f0] sm:$0xff]  ;;  %v116_v21 = vld [vmem:[%s978_s1 + $0x2f8] sm:$0xff] }
  0x23   :  { %595 = vmatpush3.bf16.msra.mxu1 %v594_v35  ;;  %v622_v22 = vpack.c.bf16 %v98_v19, %v97_v18  ;;  %v624_v23 = vpack.c.bf16 %v116_v21, %v115_v20  ;;  %v99_v24 = vld [vmem:[%s978_s1 + $0x270] sm:$0xff]  ;;  %v100_v25 = vld [vmem:[%s978_s1 + $0x278] sm:$0xff]  ;;  %v18_v27 = vld [vmem:[%s979_s0 + $0x20] sm:$0xff] }
  0x24   :  { %628 = vmatprep.subr.bf16.mxu1 %v634_v50  ;;  %195 = vmatmul.mubr.f32.vlgmr.msra.gmra.mrb[0].mxu0 %v14_v41  ;;  %v626_v26 = vpack.c.bf16 %v100_v25, %v99_v24  ;;  %v415_v29 = vld [vmem:[%s980_s2] ss:$0 sm:$0xff] }
  0x25   :  { %599 = vmatpush3.bf16.msra.mxu0 %v598_v42  ;;  %334 = vmatprep.mubr.f32.mxu0 %v19_v49 }
  0x26   :  { %265 = vmatmul.mubr.f32.vlgmr.msra.gmra.mrb[0].mxu1 %v16_v43  ;;  %601 = vmatprep.subr.bf16.mxu0 %v600_v45 }
  0x27   :  { %630 = vmatpush3.bf16.msra.mxu1 %v629_v53  ;;  %529 = vmatprep.mubr.msk.f32.mxu1 %vm635_vm0, %v636_v60 }
  0x29   :  { %603 = vmatpush3.bf16.msra.mxu0 %v602_v54 }
  0x2a   :  { %605 = vmatprep.subr.bf16.mxu0 %v604_v55  ;;  %530 = vmatmul.mubr.msk.f32.vlgmr.msra.gmra.mrb[2].mxu1 %vm126_vm1, %v20_v61 }
  0x2d   :  { %607 = vmatpush3.bf16.msra.mxu0 %v606_v62 }
  0x2e   :  { %609 = vmatprep.subr.bf16.mxu0 %v608_v63 }
  0x31   :  { %611 = vmatpush3.bf16.msra.mxu0 %v610_v4 }
  0x32   :  { %613 = vmatprep.subr.bf16.mxu0 %v612_v5 }
  0x35   :  { %615 = vmatpush3.bf16.msra.mxu0 %v614_v10 }
  0x36   :  { %617 = vmatprep.subr.bf16.mxu0 %v616_v11 }
  0x39   :  { %619 = vmatpush3.bf16.msra.mxu0 %v618_v16 }
  0x3a   :  { %621 = vmatprep.subr.bf16.mxu0 %v620_v17 }
  0x3d   :  { %623 = vmatpush3.bf16.msra.mxu0 %v622_v22 }
  0x3e   :  { %625 = vmatprep.subr.bf16.mxu0 %v624_v23 }
  0x41   :  { %627 = vmatpush3.bf16.msra.mxu0 %v626_v26 }
  0x44   :  { %335 = vmatmul.mubr.f32.vlgmr.msra.gmra.mrb[2].mxu0 %v18_v27 }
  0xf7   :  { %v449_v28 = vpop.f32.mrb[0].mxu0 }
  0xf8   :  { %v450_v30 = vpop.f32.mrb[1].mxu0 }
  0xf9   :  { %v484_v31 = vpop.f32.mrb[0].mxu1  ;;  %v451_v32 = vadd.f32 %v450_v30, %v449_v28 }
  0xfa   :  { %v485_v33 = vpop.f32.mrb[1].mxu1 }
  0xfb   :  { %v486_v34 = vadd.f32 %v485_v33, %v484_v31  ;;  %v197_v35 = vadd.f32 %v451_v32, %v415_v29 }
  0xfd   :  { %v267_v36 = vadd.f32 %v486_v34, %v197_v35  ;;  %v406_v37 = vpop.f32.mrb[2].mxu1 }
  0xfe   :  { %v531_v38 = vpop.f32.mrb[3].mxu1 }
 0x117   :  { %v519_v39 = vpop.f32.mrb[2].mxu0 }
 0x118   :  { %v520_v40 = vpop.f32.mrb[3].mxu0 }
 0x119   :  { %v521_v41 = vadd.f32 %v520_v40, %v519_v39 }
 0x11b   :  { %v337_v42 = vadd.f32 %v521_v41, %v267_v36 }
 0x11d   :  { %v407_v43 = vadd.f32 %v406_v37, %v337_v42 }
 0x11f   :  { %410 = vst [vmem:[%s981_s3] sm:$0xff] %v407_v43 }

</bundles_post_ra>
